<compile_context>
chip_gen: v7x
topology: tpu7x:2x2x1
jax: 0.10.0
libtpu: 0.0.40
codegen_flags: <defaults>
</compile_context>

<pallas_src>
import jax
import jax.numpy as jnp
from jax.experimental import pallas as pl
from jax.experimental.pallas import tpu as pltpu

_LANE = 128


def _round_up(x, m):
    return (x + m - 1) // m * m


def _vmem_budget_and_limit():
    """(working-set budget, explicit scoped-VMEM limit) per chip generation."""
    try:
        info = pltpu.get_tpu_info()
        phys = int(getattr(info, "vmem_capacity_bytes", 64 * 1024 * 1024))
    except Exception:  # non-TPU backend / interpret mode
        phys = 64 * 1024 * 1024
    if phys >= 128 * 1024 * 1024:          # v5e / v6e: 128 MiB physical
        return 90 * 1024 * 1024, 100 * 1024 * 1024
    return 24 * 1024 * 1024, 48 * 1024 * 1024   # v7x: 64 MiB physical


def _fits_edge(tile_e, tile_n, c_pad, h_pad, budget):
    resident = 4 * tile_e * c_pad                 # f32 accumulator scratch
    streamed = 2 * (
        tile_e * tile_n                           # int8 B^T tile
        + 2 * tile_n * c_pad                      # bf16 x0 tile
        + 2 * c_pad * h_pad                       # bf16 W
        + 2 * tile_e * h_pad                      # bf16 msg out
        + 4 * tile_e * c_pad                      # f32 x1 out (final layer)
    )
    return resident + streamed <= budget


def _fits_node(tile_n, e_pad, h_pad, budget):
    streamed = 2 * (
        tile_n * e_pad                            # int8 B tile
        + 2 * e_pad * h_pad                       # bf16 msg (resident per step)
        + 4 * tile_n * h_pad                      # out tile (f32 worst case)
    )
    return streamed <= budget


def _choose_tiles(n_nodes, n_edges, c_pad, h_pad, budget):
    """Pick lane-aligned power-of-two tiles that fit the VMEM budget."""
    e_cap = _round_up(n_edges, _LANE)
    n_cap = _round_up(n_nodes, _LANE)

    tile_e = _LANE
    while tile_e * 2 <= min(e_cap, 4096) and _fits_edge(
        tile_e * 2, _LANE, c_pad, h_pad, budget
    ):
        tile_e *= 2
    e_pad = _round_up(n_edges, tile_e)

    tile_n = _LANE
    while (
        tile_n * 2 <= min(n_cap, 4096)
        and _fits_edge(tile_e, tile_n * 2, c_pad, h_pad, budget)
        and _fits_node(tile_n * 2, e_pad, h_pad, budget)
    ):
        tile_n *= 2
    n_pad = _round_up(n_nodes, tile_n)

    return tile_e, tile_n, e_pad, n_pad


def _make_edge_kernel(emit_x1):
    """Edge-slab kernel: acc += B^T_tile @ x0_tile over node tiles, msg = acc@W.

    Grid = (E blocks 'parallel', N tiles 'arbitrary' reduction).
    acc lives in VMEM scratch; msg (and x1 for the final layer) are written
    once on the LAST reduction step — correct only because their out index_map
    is constant over the reduction axis (the block stays VMEM-resident and is
    written back after the last step).
    """

    def kernel(bt_ref, x0_ref, w_ref, *refs):
        if emit_x1:
            msg_ref, x1_ref, acc_ref = refs
        else:
            msg_ref, acc_ref = refs

        i = pl.program_id(1)
        partial = jnp.dot(
            bt_ref[...].astype(jnp.float32),        # int8 -> f32 in-kernel
            x0_ref[...].astype(jnp.float32),        # bf16 -> f32 in-kernel
            preferred_element_type=jnp.float32,
        )

        @pl.when(i == 0)
        def _():
            acc_ref[...] = partial                  # direct store, no zero-fill

        @pl.when(i != 0)
        def _():
            acc_ref[...] += partial

        @pl.when(i == pl.num_programs(1) - 1)
        def _():
            msg = jnp.dot(
                acc_ref[...],
                w_ref[...].astype(jnp.float32),
                preferred_element_type=jnp.float32,
            )
            msg_ref[...] = msg.astype(msg_ref.dtype)
            if emit_x1:
                x1_ref[...] = acc_ref[...]

    return kernel


def _node_kernel(b_ref, msg_ref, x0_ref):
    """Per node tile: x0_tile = B_tile @ msg (independent tiles -> 'parallel')."""
    x0_ref[...] = jnp.dot(
        b_ref[...].astype(jnp.float32),
        msg_ref[...].astype(jnp.float32),
        preferred_element_type=jnp.float32,
    ).astype(x0_ref.dtype)


def _unigcn_layer(bt_i8, b_i8, x0_bf16, w_bf16, tile_e, tile_n, final, vmem_limit):
    """One UniGCNLayer on padded operands.

    Returns (x0_new, x1) where x1 is None for non-final layers and x0_new is
    bf16 (intermediate) or f32 (final).
    """
    e_pad, n_pad = bt_i8.shape
    c_pad = x0_bf16.shape[1]
    h_pad = w_bf16.shape[1]
    n_tiles = n_pad // tile_n
    e_tiles = e_pad // tile_e

    edge_out_shape = [jax.ShapeDtypeStruct((e_pad, h_pad), jnp.bfloat16)]
    edge_out_specs = [pl.BlockSpec((tile_e, h_pad), lambda e, i: (e, 0))]
    if final:
        edge_out_shape.append(jax.ShapeDtypeStruct((e_pad, c_pad), jnp.float32))
        edge_out_specs.append(pl.BlockSpec((tile_e, c_pad), lambda e, i: (e, 0)))

    edge_bytes = (
        e_pad * n_pad                # B^T (int8)
        + 2 * n_pad * c_pad          # x0 (bf16)
        + 2 * c_pad * h_pad          # W (bf16)
        + 2 * e_pad * h_pad          # msg out (bf16)
        + (4 * e_pad * c_pad if final else 0)
    )
    edge_outs = pl.pallas_call(
        _make_edge_kernel(final),
        out_shape=tuple(edge_out_shape),
        grid=(e_tiles, n_tiles),
        in_specs=[
            pl.BlockSpec((tile_e, tile_n), lambda e, i: (e, i)),
            pl.BlockSpec((tile_n, c_pad), lambda e, i: (i, 0)),
            pl.BlockSpec((c_pad, h_pad), lambda e, i: (0, 0)),
        ],
        out_specs=tuple(edge_out_specs),
        scratch_shapes=[pltpu.VMEM((tile_e, c_pad), jnp.float32)],
        compiler_params=pltpu.CompilerParams(
            dimension_semantics=("parallel", "arbitrary"),
            vmem_limit_bytes=vmem_limit,
        ),
        cost_estimate=pl.CostEstimate(
            flops=2 * e_pad * n_pad * c_pad + 2 * e_pad * c_pad * h_pad,
            transcendentals=0,
            bytes_accessed=edge_bytes,
        ),
    )(bt_i8, x0_bf16, w_bf16)

    msg = edge_outs[0]
    x1 = edge_outs[1] if final else None

    out_dtype = jnp.float32 if final else jnp.bfloat16
    out_bytes_per_el = 4 if final else 2
    x0_new = pl.pallas_call(
        _node_kernel,
        out_shape=jax.ShapeDtypeStruct((n_pad, h_pad), out_dtype),
        grid=(n_tiles,),
        in_specs=[
            pl.BlockSpec((tile_n, e_pad), lambda i: (i, 0)),
            pl.BlockSpec((e_pad, h_pad), lambda i: (0, 0)),
        ],
        out_specs=pl.BlockSpec((tile_n, h_pad), lambda i: (i, 0)),
        compiler_params=pltpu.CompilerParams(
            dimension_semantics=("parallel",),
            vmem_limit_bytes=vmem_limit,
        ),
        cost_estimate=pl.CostEstimate(
            flops=2 * n_pad * e_pad * h_pad,
            transcendentals=0,
            bytes_accessed=(
                n_pad * e_pad                # B (int8)
                + 2 * e_pad * h_pad          # msg (bf16)
                + out_bytes_per_el * n_pad * h_pad
            ),
        ),
    )(b_i8, msg)

    return x0_new, x1


def unigcn_forward(x_0, incidence_1, params):
    """UniGCN.forward: stack of UniGCNLayers; returns (x_0, x_1) of last layer."""
    n_nodes, n_edges = incidence_1.shape
    in_ch = x_0.shape[1]
    n_layers = len(params)

    budget, vmem_limit = _vmem_budget_and_limit()
    c_pads = [_round_up(w.shape[0], _LANE) for w in params]
    h_pads = [_round_up(w.shape[1], _LANE) for w in params]
    tile_e, tile_n, e_pad, n_pad = _choose_tiles(
        n_nodes, n_edges, max(c_pads), max(h_pads), budget
    )

    # Incidence stored once as int8 (exact for 0/1), transposed once.
    b_i8 = (
        jnp.zeros((n_pad, e_pad), jnp.int8)
        .at[:n_nodes, :n_edges]
        .set(incidence_1.astype(jnp.int8))
    )
    bt_i8 = b_i8.T                                       # (E_pad, N_pad)

    x0_bf16 = (
        jnp.zeros((n_pad, c_pads[0]), jnp.bfloat16)
        .at[:n_nodes, :in_ch]
        .set(x_0.astype(jnp.bfloat16))
    )

    x0_out = None
    x1_pad = None
    for li, (w, c_pad, h_pad) in enumerate(zip(params, c_pads, h_pads)):
        w_bf16 = (
            jnp.zeros((c_pad, h_pad), jnp.bfloat16)
            .at[: w.shape[0], : w.shape[1]]
            .set(w.astype(jnp.bfloat16))
        )
        final = li == n_layers - 1
        x0_next, x1 = _unigcn_layer(
            bt_i8, b_i8, x0_bf16, w_bf16, tile_e, tile_n, final, vmem_limit
        )
        if final:
            x0_out = x0_next          # f32
            x1_pad = x1               # f32
        else:
            x0_bf16 = x0_next         # bf16, fed directly to next layer

    last_h = params[-1].shape[1]
    last_c_in = params[-1].shape[0]
    return x0_out[:n_nodes, :last_h], x1_pad[:n_edges, :last_c_in]


def init_unigcn_params(key, in_channels, hidden_channels, n_layers=2):
    """Deterministic xavier_uniform(gain=1.414) init matching Conv weight shapes."""
    params = []
    dims = [(in_channels, hidden_channels)] + [
        (hidden_channels, hidden_channels) for _ in range(n_layers - 1)
    ]
    gain = 1.414
    for fan_in, fan_out in dims:
        key, sub = jax.random.split(key)
        bound = gain * (6.0 / (fan_in + fan_out)) ** 0.5
        params.append(
            jax.random.uniform(
                sub, (fan_in, fan_out), dtype=jnp.float32, minval=-bound, maxval=bound
            )
        )
    return params


def unigcn_reference(x_0, incidence_1, params):
    """Pure-JAX (f32 matmuls) reference matching the kernel's rounding points."""
    b = incidence_1.astype(jnp.float32)
    x0 = x_0.astype(jnp.bfloat16).astype(jnp.float32)
    x1 = None
    last = len(params) - 1
    for li, w in enumerate(params):
        wf = w.astype(jnp.bfloat16).astype(jnp.float32)
        x1 = jnp.dot(b.T, x0, preferred_element_type=jnp.float32)
        msg = (
            jnp.dot(x1, wf, preferred_element_type=jnp.float32)
            .astype(jnp.bfloat16)
            .astype(jnp.float32)
        )
        x0 = jnp.dot(b, msg, preferred_element_type=jnp.float32)
        if li != last:
            x0 = x0.astype(jnp.bfloat16).astype(jnp.float32)
    return x0, x1


if __name__ == "__main__":
    n_nodes = 16
    n_edges = 8
    in_channels = 8
    hidden_channels = 32
    n_layers = 2

    key = jax.random.PRNGKey(0)
    k_x, k_inc, k_w = jax.random.split(key, 3)

    x_0 = jax.random.normal(k_x, (n_nodes, in_channels), dtype=jnp.float32)
    incidence_1 = jax.random.bernoulli(
        k_inc, p=0.4, shape=(n_nodes, n_edges)
    ).astype(jnp.float32)
    params = init_unigcn_params(k_w, in_channels, hidden_channels, n_layers)

    x0_out, x1_out = jax.jit(unigcn_forward)(x_0, incidence_1, params)
    jax.block_until_ready((x0_out, x1_out))

    x0_ref, x1_ref = unigcn_reference(x_0, incidence_1, params)
    assert x0_out.shape == (n_nodes, hidden_channels)
    assert x1_out.shape == (n_edges, hidden_channels)
    assert jnp.allclose(x0_out, x0_ref, atol=2e-2, rtol=2e-2)
    assert jnp.allclose(x1_out, x1_ref, atol=2e-2, rtol=2e-2)

    print("KERNEL_OK")
</pallas_src>

<mosaic_0001>
module attributes {stable_mosaic.version = 11 : i64} {
  func.func @_node_kernel(%arg0: i32, %arg1: memref<128x128xi8, #tpu.memory_space<vmem>>, %arg2: memref<128x128xbf16, #tpu.memory_space<vmem>>, %arg3: memref<128x128xbf16, #tpu.memory_space<vmem>>) attributes {dimension_semantics = [#tpu.dimension_semantics<parallel>], iteration_bounds = array<i64: 1>, scalar_prefetch = 0 : i64, scratch_operands = 0 : i64, tpu.core_type = #tpu.core_type<tc>, window_params = [{transform_indices = @transform_0, window_bounds = array<i64: 128, 128>}, {pipeline_mode = #tpu.pipeline_mode<synchronous>, transform_indices = @transform_1, window_bounds = array<i64: 128, 128>}, {transform_indices = @transform_2, window_bounds = array<i64: 128, 128>}]} {
    %c0 = arith.constant 0 : index
    %c0_0 = arith.constant 0 : index
    %0 = vector.load %arg1[%c0, %c0_0] : memref<128x128xi8, #tpu.memory_space<vmem>>, vector<128x128xi8>
    %1 = arith.sitofp %0 : vector<128x128xi8> to vector<128x128xf32>
    %c0_1 = arith.constant 0 : index
    %c0_2 = arith.constant 0 : index
    %2 = vector.load %arg2[%c0_1, %c0_2] : memref<128x128xbf16, #tpu.memory_space<vmem>>, vector<128x128xbf16>
    %3 = arith.extf %2 : vector<128x128xbf16> to vector<128x128xf32>
    %cst = arith.constant dense<0.000000e+00> : vector<128x128xf32>
    %4 = tpu.matmul %1, %3, %cst {dimension_numbers = #tpu.dot_dimension_numbers<[1], [0], [0], [1], [0, 0, 1, 1], [], []>} : vector<128x128xf32>, vector<128x128xf32>, vector<128x128xf32> -> vector<128x128xf32>
    %5 = arith.truncf %4 : vector<128x128xf32> to vector<128x128xbf16>
    %c0_3 = arith.constant 0 : index
    %c0_4 = arith.constant 0 : index
    %6 = vector.load %arg3[%c0_3, %c0_4] : memref<128x128xbf16, #tpu.memory_space<vmem>>, vector<128x128xbf16>
    tpu.vector_store %arg3[%c0_3, %c0_4], %5 {strides = array<i32>} : memref<128x128xbf16, #tpu.memory_space<vmem>>, vector<128x128xbf16>,
    return
  }
  func.func @transform_0(%arg0: i32) -> (i32, i32) {
    %c0_i32 = arith.constant 0 : i32
    %c0_i32_0 = arith.constant 0 : i32
    return %arg0, %c0_i32 : i32, i32
  }
  func.func @transform_1(%arg0: i32) -> (i32, i32) {
    %c0_i32 = arith.constant 0 : i32
    %c0_i32_0 = arith.constant 0 : i32
    %c0_i32_1 = arith.constant 0 : i32
    return %c0_i32, %c0_i32_0 : i32, i32
  }
  func.func @transform_2(%arg0: i32) -> (i32, i32) {
    %c0_i32 = arith.constant 0 : i32
    %c0_i32_0 = arith.constant 0 : i32
    return %arg0, %c0_i32 : i32, i32
  }
}

module attributes {stable_mosaic.version = 11 : i64} {
  func.func @kernel(%arg0: i32, %arg1: i32, %arg2: memref<128x128xi8, #tpu.memory_space<vmem>>, %arg3: memref<128x128xbf16, #tpu.memory_space<vmem>>, %arg4: memref<128x128xbf16, #tpu.memory_space<vmem>>, %arg5: memref<128x128xbf16, #tpu.memory_space<vmem>>, %arg6: memref<128x128xf32, #tpu.memory_space<vmem>>) attributes {dimension_semantics = [#tpu.dimension_semantics<parallel>, #tpu.dimension_semantics<arbitrary>], iteration_bounds = array<i64: 1, 1>, scalar_prefetch = 0 : i64, scratch_operands = 1 : i64, tpu.core_type = #tpu.core_type<tc>, window_params = [{transform_indices = @transform_0, window_bounds = array<i64: 128, 128>}, {transform_indices = @transform_1, window_bounds = array<i64: 128, 128>}, {pipeline_mode = #tpu.pipeline_mode<synchronous>, transform_indices = @transform_2, window_bounds = array<i64: 128, 128>}, {transform_indices = @transform_3, window_bounds = array<i64: 128, 128>}]} {
    %c0 = arith.constant 0 : index
    %c0_0 = arith.constant 0 : index
    %0 = vector.load %arg2[%c0, %c0_0] : memref<128x128xi8, #tpu.memory_space<vmem>>, vector<128x128xi8>
    %1 = arith.sitofp %0 : vector<128x128xi8> to vector<128x128xf32>
    %c0_1 = arith.constant 0 : index
    %c0_2 = arith.constant 0 : index
    %2 = vector.load %arg3[%c0_1, %c0_2] : memref<128x128xbf16, #tpu.memory_space<vmem>>, vector<128x128xbf16>
    %3 = arith.extf %2 : vector<128x128xbf16> to vector<128x128xf32>
    %cst = arith.constant dense<0.000000e+00> : vector<128x128xf32>
    %4 = tpu.matmul %1, %3, %cst {dimension_numbers = #tpu.dot_dimension_numbers<[1], [0], [0], [1], [0, 0, 1, 1], [], []>} : vector<128x128xf32>, vector<128x128xf32>, vector<128x128xf32> -> vector<128x128xf32>
    %c0_i32 = arith.constant 0 : i32
    %5 = arith.cmpi eq, %arg1, %c0_i32 : i32
    %6 = arith.extui %5 : i1 to i32
    %c0_i32_3 = arith.constant 0 : i32
    %7 = arith.cmpi ne, %6, %c0_i32_3 : i32
    scf.if %7 {
      %c0_8 = arith.constant 0 : index
      %c0_9 = arith.constant 0 : index
      %14 = vector.load %arg6[%c0_8, %c0_9] : memref<128x128xf32, #tpu.memory_space<vmem>>, vector<128x128xf32>
      tpu.vector_store %arg6[%c0_8, %c0_9], %4 {strides = array<i32>} : memref<128x128xf32, #tpu.memory_space<vmem>>, vector<128x128xf32>,
    } else {
    }
    %c0_i32_4 = arith.constant 0 : i32
    %8 = arith.cmpi ne, %arg1, %c0_i32_4 : i32
    %9 = arith.extui %8 : i1 to i32
    %c0_i32_5 = arith.constant 0 : i32
    %10 = arith.cmpi ne, %9, %c0_i32_5 : i32
    scf.if %10 {
      %c0_8 = arith.constant 0 : index
      %c0_9 = arith.constant 0 : index
      %14 = vector.load %arg6[%c0_8, %c0_9] : memref<128x128xf32, #tpu.memory_space<vmem>>, vector<128x128xf32>
      %15 = arith.addf %14, %4 : vector<128x128xf32>
      %c0_10 = arith.constant 0 : index
      %c0_11 = arith.constant 0 : index
      %16 = vector.load %arg6[%c0_10, %c0_11] : memref<128x128xf32, #tpu.memory_space<vmem>>, vector<128x128xf32>
      tpu.vector_store %arg6[%c0_10, %c0_11], %15 {strides = array<i32>} : memref<128x128xf32, #tpu.memory_space<vmem>>, vector<128x128xf32>,
    } else {
    }
    %c0_i32_6 = arith.constant 0 : i32
    %11 = arith.cmpi eq, %arg1, %c0_i32_6 : i32
    %12 = arith.extui %11 : i1 to i32
    %c0_i32_7 = arith.constant 0 : i32
    %13 = arith.cmpi ne, %12, %c0_i32_7 : i32
    scf.if %13 {
      %c0_8 = arith.constant 0 : index
      %c0_9 = arith.constant 0 : index
      %14 = vector.load %arg6[%c0_8, %c0_9] : memref<128x128xf32, #tpu.memory_space<vmem>>, vector<128x128xf32>
      %c0_10 = arith.constant 0 : index
      %c0_11 = arith.constant 0 : index
      %15 = vector.load %arg4[%c0_10, %c0_11] : memref<128x128xbf16, #tpu.memory_space<vmem>>, vector<128x128xbf16>
      %16 = arith.extf %15 : vector<128x128xbf16> to vector<128x128xf32>
      %cst_12 = arith.constant dense<0.000000e+00> : vector<128x128xf32>
      %17 = tpu.matmul %14, %16, %cst_12 {dimension_numbers = #tpu.dot_dimension_numbers<[1], [0], [0], [1], [0, 0, 1, 1], [], []>} : vector<128x128xf32>, vector<128x128xf32>, vector<128x128xf32> -> vector<128x128xf32>
      %18 = arith.truncf %17 : vector<128x128xf32> to vector<128x128xbf16>
      %c0_13 = arith.constant 0 : index
      %c0_14 = arith.constant 0 : index
      %19 = vector.load %arg5[%c0_13, %c0_14] : memref<128x128xbf16, #tpu.memory_space<vmem>>, vector<128x128xbf16>
      tpu.vector_store %arg5[%c0_13, %c0_14], %18 {strides = array<i32>} : memref<128x128xbf16, #tpu.memory_space<vmem>>, vector<128x128xbf16>,
    } else {
    }
    return
  }
  func.func @transform_0(%arg0: i32, %arg1: i32) -> (i32, i32) {
    %c0_i32 = arith.constant 0 : i32
    return %arg0, %arg1 : i32, i32
  }
  func.func @transform_1(%arg0: i32, %arg1: i32) -> (i32, i32) {
    %c0_i32 = arith.constant 0 : i32
    %c0_i32_0 = arith.constant 0 : i32
    return %arg1, %c0_i32 : i32, i32
  }
  func.func @transform_2(%arg0: i32, %arg1: i32) -> (i32, i32) {
    %c0_i32 = arith.constant 0 : i32
    %c0_i32_0 = arith.constant 0 : i32
    %c0_i32_1 = arith.constant 0 : i32
    return %c0_i32, %c0_i32_0 : i32, i32
  }
  func.func @transform_3(%arg0: i32, %arg1: i32) -> (i32, i32) {
    %c0_i32 = arith.constant 0 : i32
    %c0_i32_0 = arith.constant 0 : i32
    return %arg0, %c0_i32 : i32, i32
  }
}

module attributes {stable_mosaic.version = 11 : i64} {
  func.func @kernel(%arg0: i32, %arg1: i32, %arg2: memref<128x128xi8, #tpu.memory_space<vmem>>, %arg3: memref<128x128xbf16, #tpu.memory_space<vmem>>, %arg4: memref<128x128xbf16, #tpu.memory_space<vmem>>, %arg5: memref<128x128xbf16, #tpu.memory_space<vmem>>, %arg6: memref<128x128xf32, #tpu.memory_space<vmem>>, %arg7: memref<128x128xf32, #tpu.memory_space<vmem>>) attributes {dimension_semantics = [#tpu.dimension_semantics<parallel>, #tpu.dimension_semantics<arbitrary>], iteration_bounds = array<i64: 1, 1>, scalar_prefetch = 0 : i64, scratch_operands = 1 : i64, tpu.core_type = #tpu.core_type<tc>, window_params = [{transform_indices = @transform_0, window_bounds = array<i64: 128, 128>}, {transform_indices = @transform_1, window_bounds = array<i64: 128, 128>}, {pipeline_mode = #tpu.pipeline_mode<synchronous>, transform_indices = @transform_2, window_bounds = array<i64: 128, 128>}, {transform_indices = @transform_3, window_bounds = array<i64: 128, 128>}, {transform_indices = @transform_4, window_bounds = array<i64: 128, 128>}]} {
    %c0 = arith.constant 0 : index
    %c0_0 = arith.constant 0 : index
    %0 = vector.load %arg2[%c0, %c0_0] : memref<128x128xi8, #tpu.memory_space<vmem>>, vector<128x128xi8>
    %1 = arith.sitofp %0 : vector<128x128xi8> to vector<128x128xf32>
    %c0_1 = arith.constant 0 : index
    %c0_2 = arith.constant 0 : index
    %2 = vector.load %arg3[%c0_1, %c0_2] : memref<128x128xbf16, #tpu.memory_space<vmem>>, vector<128x128xbf16>
    %3 = arith.extf %2 : vector<128x128xbf16> to vector<128x128xf32>
    %cst = arith.constant dense<0.000000e+00> : vector<128x128xf32>
    %4 = tpu.matmul %1, %3, %cst {dimension_numbers = #tpu.dot_dimension_numbers<[1], [0], [0], [1], [0, 0, 1, 1], [], []>} : vector<128x128xf32>, vector<128x128xf32>, vector<128x128xf32> -> vector<128x128xf32>
    %c0_i32 = arith.constant 0 : i32
    %5 = arith.cmpi eq, %arg1, %c0_i32 : i32
    %6 = arith.extui %5 : i1 to i32
    %c0_i32_3 = arith.constant 0 : i32
    %7 = arith.cmpi ne, %6, %c0_i32_3 : i32
    scf.if %7 {
      %c0_8 = arith.constant 0 : index
      %c0_9 = arith.constant 0 : index
      %14 = vector.load %arg7[%c0_8, %c0_9] : memref<128x128xf32, #tpu.memory_space<vmem>>, vector<128x128xf32>
      tpu.vector_store %arg7[%c0_8, %c0_9], %4 {strides = array<i32>} : memref<128x128xf32, #tpu.memory_space<vmem>>, vector<128x128xf32>,
    } else {
    }
    %c0_i32_4 = arith.constant 0 : i32
    %8 = arith.cmpi ne, %arg1, %c0_i32_4 : i32
    %9 = arith.extui %8 : i1 to i32
    %c0_i32_5 = arith.constant 0 : i32
    %10 = arith.cmpi ne, %9, %c0_i32_5 : i32
    scf.if %10 {
      %c0_8 = arith.constant 0 : index
      %c0_9 = arith.constant 0 : index
      %14 = vector.load %arg7[%c0_8, %c0_9] : memref<128x128xf32, #tpu.memory_space<vmem>>, vector<128x128xf32>
      %15 = arith.addf %14, %4 : vector<128x128xf32>
      %c0_10 = arith.constant 0 : index
      %c0_11 = arith.constant 0 : index
      %16 = vector.load %arg7[%c0_10, %c0_11] : memref<128x128xf32, #tpu.memory_space<vmem>>, vector<128x128xf32>
      tpu.vector_store %arg7[%c0_10, %c0_11], %15 {strides = array<i32>} : memref<128x128xf32, #tpu.memory_space<vmem>>, vector<128x128xf32>,
    } else {
    }
    %c0_i32_6 = arith.constant 0 : i32
    %11 = arith.cmpi eq, %arg1, %c0_i32_6 : i32
    %12 = arith.extui %11 : i1 to i32
    %c0_i32_7 = arith.constant 0 : i32
    %13 = arith.cmpi ne, %12, %c0_i32_7 : i32
    scf.if %13 {
      %c0_8 = arith.constant 0 : index
      %c0_9 = arith.constant 0 : index
      %14 = vector.load %arg7[%c0_8, %c0_9] : memref<128x128xf32, #tpu.memory_space<vmem>>, vector<128x128xf32>
      %c0_10 = arith.constant 0 : index
      %c0_11 = arith.constant 0 : index
      %15 = vector.load %arg4[%c0_10, %c0_11] : memref<128x128xbf16, #tpu.memory_space<vmem>>, vector<128x128xbf16>
      %16 = arith.extf %15 : vector<128x128xbf16> to vector<128x128xf32>
      %cst_12 = arith.constant dense<0.000000e+00> : vector<128x128xf32>
      %17 = tpu.matmul %14, %16, %cst_12 {dimension_numbers = #tpu.dot_dimension_numbers<[1], [0], [0], [1], [0, 0, 1, 1], [], []>} : vector<128x128xf32>, vector<128x128xf32>, vector<128x128xf32> -> vector<128x128xf32>
      %18 = arith.truncf %17 : vector<128x128xf32> to vector<128x128xbf16>
      %c0_13 = arith.constant 0 : index
      %c0_14 = arith.constant 0 : index
      %19 = vector.load %arg5[%c0_13, %c0_14] : memref<128x128xbf16, #tpu.memory_space<vmem>>, vector<128x128xbf16>
      tpu.vector_store %arg5[%c0_13, %c0_14], %18 {strides = array<i32>} : memref<128x128xbf16, #tpu.memory_space<vmem>>, vector<128x128xbf16>,
      %c0_15 = arith.constant 0 : index
      %c0_16 = arith.constant 0 : index
      %20 = vector.load %arg7[%c0_15, %c0_16] : memref<128x128xf32, #tpu.memory_space<vmem>>, vector<128x128xf32>
      %c0_17 = arith.constant 0 : index
      %c0_18 = arith.constant 0 : index
      %21 = vector.load %arg6[%c0_17, %c0_18] : memref<128x128xf32, #tpu.memory_space<vmem>>, vector<128x128xf32>
      tpu.vector_store %arg6[%c0_17, %c0_18], %20 {strides = array<i32>} : memref<128x128xf32, #tpu.memory_space<vmem>>, vector<128x128xf32>,
    } else {
    }
    return
  }
  func.func @transform_0(%arg0: i32, %arg1: i32) -> (i32, i32) {
    %c0_i32 = arith.constant 0 : i32
    return %arg0, %arg1 : i32, i32
  }
  func.func @transform_1(%arg0: i32, %arg1: i32) -> (i32, i32) {
    %c0_i32 = arith.constant 0 : i32
    %c0_i32_0 = arith.constant 0 : i32
    return %arg1, %c0_i32 : i32, i32
  }
  func.func @transform_2(%arg0: i32, %arg1: i32) -> (i32, i32) {
    %c0_i32 = arith.constant 0 : i32
    %c0_i32_0 = arith.constant 0 : i32
    %c0_i32_1 = arith.constant 0 : i32
    return %c0_i32, %c0_i32_0 : i32, i32
  }
  func.func @transform_3(%arg0: i32, %arg1: i32) -> (i32, i32) {
    %c0_i32 = arith.constant 0 : i32
    %c0_i32_0 = arith.constant 0 : i32
    return %arg0, %c0_i32 : i32, i32
  }
  func.func @transform_4(%arg0: i32, %arg1: i32) -> (i32, i32) {
    %c0_i32 = arith.constant 0 : i32
    %c0_i32_0 = arith.constant 0 : i32
    return %arg0, %c0_i32 : i32, i32
  }
}

module attributes {stable_mosaic.version = 11 : i64} {
  func.func @_node_kernel(%arg0: i32, %arg1: memref<128x128xi8, #tpu.memory_space<vmem>>, %arg2: memref<128x128xbf16, #tpu.memory_space<vmem>>, %arg3: memref<128x128xf32, #tpu.memory_space<vmem>>) attributes {dimension_semantics = [#tpu.dimension_semantics<parallel>], iteration_bounds = array<i64: 1>, scalar_prefetch = 0 : i64, scratch_operands = 0 : i64, tpu.core_type = #tpu.core_type<tc>, window_params = [{transform_indices = @transform_0, window_bounds = array<i64: 128, 128>}, {pipeline_mode = #tpu.pipeline_mode<synchronous>, transform_indices = @transform_1, window_bounds = array<i64: 128, 128>}, {transform_indices = @transform_2, window_bounds = array<i64: 128, 128>}]} {
    %c0 = arith.constant 0 : index
    %c0_0 = arith.constant 0 : index
    %0 = vector.load %arg1[%c0, %c0_0] : memref<128x128xi8, #tpu.memory_space<vmem>>, vector<128x128xi8>
    %1 = arith.sitofp %0 : vector<128x128xi8> to vector<128x128xf32>
    %c0_1 = arith.constant 0 : index
    %c0_2 = arith.constant 0 : index
    %2 = vector.load %arg2[%c0_1, %c0_2] : memref<128x128xbf16, #tpu.memory_space<vmem>>, vector<128x128xbf16>
    %3 = arith.extf %2 : vector<128x128xbf16> to vector<128x128xf32>
    %cst = arith.constant dense<0.000000e+00> : vector<128x128xf32>
    %4 = tpu.matmul %1, %3, %cst {dimension_numbers = #tpu.dot_dimension_numbers<[1], [0], [0], [1], [0, 0, 1, 1], [], []>} : vector<128x128xf32>, vector<128x128xf32>, vector<128x128xf32> -> vector<128x128xf32>
    %c0_3 = arith.constant 0 : index
    %c0_4 = arith.constant 0 : index
    %5 = vector.load %arg3[%c0_3, %c0_4] : memref<128x128xf32, #tpu.memory_space<vmem>>, vector<128x128xf32>
    tpu.vector_store %arg3[%c0_3, %c0_4], %4 {strides = array<i32>} : memref<128x128xf32, #tpu.memory_space<vmem>>, vector<128x128xf32>,
    return
  }
  func.func @transform_0(%arg0: i32) -> (i32, i32) {
    %c0_i32 = arith.constant 0 : i32
    %c0_i32_0 = arith.constant 0 : i32
    return %arg0, %c0_i32 : i32, i32
  }
  func.func @transform_1(%arg0: i32) -> (i32, i32) {
    %c0_i32 = arith.constant 0 : i32
    %c0_i32_0 = arith.constant 0 : i32
    %c0_i32_1 = arith.constant 0 : i32
    return %c0_i32, %c0_i32_0 : i32, i32
  }
  func.func @transform_2(%arg0: i32) -> (i32, i32) {
    %c0_i32 = arith.constant 0 : i32
    %c0_i32_0 = arith.constant 0 : i32
    return %arg0, %c0_i32 : i32, i32
  }
}

</mosaic_0001>

<bundles_post_ra>
// kernel: unigcn_forward.7
= control target key start
LH: loop header
LB: loop body
LE: loop exit
PB: predicated region body
PF: predicated region fallthrough
CT: control target
= control target key end

     0   :  { %s518_s1 = inlined_call_operand.vmem [shape: bf16[128,128], index: 1, kind: input, shape index: {}]   ;;  %s519_s0 = inlined_call_operand.vmem [shape: s8[128,128], index: 0, kind: input, shape index: {}]   ;;  %s520_s2 = inlined_call_operand.vmem [shape: f32[128,128], index: 2, kind: output, shape index: {}]  }
   0x1   :  { %v245_v0 = vld [vmem:[%s518_s1] sm:$0xff]   ;;  %v276_v1 = vld [vmem:[%s518_s1 + $0x8] sm:$0xff]   ;;  %v13_v4 = vld [vmem:[%s519_s0 + $0x10] sm:$0xff] }
   0x2   :  { %372 = vmatprep.subr.bf16.mxu0 %v245_v0  ;;  %403 = vmatprep.subr.bf16.mxu1 %v245_v0  ;;  %v11_v2 = vld [vmem:[%s519_s0] sm:$0xff]  ;;  %v277_v5 = vld [vmem:[%s518_s1 + $0x10] sm:$0xff]   ;;  %v23_v6 = vunpack.c.0.s8 %v13_v4  ;;  %v278_v9 = vld [vmem:[%s518_s1 + $0x18] sm:$0xff]   ;;  %v24_v15 = vunpack.c.1.s8 %v13_v4  ;;  %v25_v17 = vunpack.c.2.s8 %v13_v4  ;;  %v26_v23 = vunpack.c.3.s8 %v13_v4 }
   0x3   :  { %374 = vmatpush3.bf16.msra.mxu0 %v245_v0  ;;  %411 = vmatpush3.bf16.msra.mxu1 %v245_v0  ;;  %v15_v3 = vunpack.c.0.s8 %v11_v2  ;;  %v279_v10 = vld [vmem:[%s518_s1 + $0x20] sm:$0xff]   ;;  %v280_v11 = vld [vmem:[%s518_s1 + $0x28] sm:$0xff]   ;;  %v281_v12 = vld [vmem:[%s518_s1 + $0x30] sm:$0xff]   ;;  %v16_v14 = vunpack.c.1.s8 %v11_v2  ;;  %v17_v16 = vunpack.c.2.s8 %v11_v2  ;;  %v18_v22 = vunpack.c.3.s8 %v11_v2 }
   0x4   :  { %376 = vmatprep.subr.bf16.mxu0 %v276_v1  ;;  %404 = vmatprep.subr.bf16.mxu1 %v276_v1  ;;  %v39_v8 = vcvt.s32.f32 %v23_v6  ;;  %v282_v13 = vld [vmem:[%s518_s1 + $0x38] sm:$0xff]   ;;  %v12_v18 = vld [vmem:[%s519_s0 + $0x8] sm:$0xff]  ;;  %v40_v21 = vcvt.s32.f32 %v24_v15  ;;  %v41_v25 = vcvt.s32.f32 %v25_v17  ;;  %v42_v29 = vcvt.s32.f32 %v26_v23 }
   0x5   :  { %v31_v7 = vcvt.s32.f32 %v15_v3  ;;  %v14_v19 = vld [vmem:[%s519_s0 + $0x18] sm:$0xff]  ;;  %v32_v20 = vcvt.s32.f32 %v16_v14  ;;  %v33_v24 = vcvt.s32.f32 %v17_v16  ;;  %v19_v26 = vunpack.c.0.s8 %v12_v18 }
   0x6   :  { %359 = vmatprep.mubr.f32.mxu1 %v39_v8  ;;  %v27_v27 = vunpack.c.0.s8 %v14_v19  ;;  %v34_v28 = vcvt.s32.f32 %v18_v22  ;;  %v20_v30 = vunpack.c.1.s8 %v12_v18  ;;  %v28_v31 = vunpack.c.1.s8 %v14_v19 }
   0x7   :  { %378 = vmatpush3.bf16.msra.mxu0 %v276_v1  ;;  %412 = vmatpush3.bf16.msra.mxu1 %v276_v1  ;;  %v35_v32 = vcvt.s32.f32 %v19_v26  ;;  %v21_v34 = vunpack.c.2.s8 %v12_v18  ;;  %v29_v35 = vunpack.c.2.s8 %v14_v19  ;;  %v22_v38 = vunpack.c.3.s8 %v12_v18 }
   0x8   :  { %380 = vmatprep.subr.bf16.mxu0 %v277_v5  ;;  %405 = vmatprep.subr.bf16.mxu1 %v277_v5  ;;  %v43_v33 = vcvt.s32.f32 %v27_v27  ;;  %v36_v36 = vcvt.s32.f32 %v20_v30  ;;  %v44_v37 = vcvt.s32.f32 %v28_v31  ;;  %v30_v39 = vunpack.c.3.s8 %v14_v19 }
   0x9   :  { %347 = vmatprep.mubr.f32.mxu0 %v31_v7  ;;  %v37_v40 = vcvt.s32.f32 %v21_v34  ;;  %v45_v41 = vcvt.s32.f32 %v29_v35  ;;  %v38_v42 = vcvt.s32.f32 %v22_v38 }
   0xa   :  { %v46_v43 = vcvt.s32.f32 %v30_v39 }
   0xb   :  { %382 = vmatpush3.bf16.msra.mxu0 %v277_v5  ;;  %413 = vmatpush3.bf16.msra.mxu1 %v277_v5 }
   0xc   :  { %384 = vmatprep.subr.bf16.mxu0 %v278_v9  ;;  %406 = vmatprep.subr.bf16.mxu1 %v278_v9 }
   0xf   :  { %386 = vmatpush3.bf16.msra.mxu0 %v278_v9  ;;  %414 = vmatpush3.bf16.msra.mxu1 %v278_v9 }
  0x10   :  { %388 = vmatprep.subr.bf16.mxu0 %v279_v10  ;;  %407 = vmatprep.subr.bf16.mxu1 %v279_v10 }
  0x13   :  { %390 = vmatpush3.bf16.msra.mxu0 %v279_v10  ;;  %415 = vmatpush3.bf16.msra.mxu1 %v279_v10 }
  0x14   :  { %392 = vmatprep.subr.bf16.mxu0 %v280_v11  ;;  %408 = vmatprep.subr.bf16.mxu1 %v280_v11 }
  0x17   :  { %394 = vmatpush3.bf16.msra.mxu0 %v280_v11  ;;  %416 = vmatpush3.bf16.msra.mxu1 %v280_v11 }
  0x18   :  { %396 = vmatprep.subr.bf16.mxu0 %v281_v12  ;;  %409 = vmatprep.subr.bf16.mxu1 %v281_v12 }
  0x1b   :  { %398 = vmatpush3.bf16.msra.mxu0 %v281_v12  ;;  %417 = vmatpush3.bf16.msra.mxu1 %v281_v12 }
  0x1c   :  { %400 = vmatprep.subr.bf16.mxu0 %v282_v13  ;;  %410 = vmatprep.subr.bf16.mxu1 %v282_v13 }
  0x1f   :  { %402 = vmatpush3.bf16.msra.mxu0 %v282_v13  ;;  %418 = vmatpush3.bf16.msra.mxu1 %v282_v13 }
  0x22   :  { %348 = vmatmul.mubr.f32.vlgmr.msra.gmra.mrb[0].mxu0 %v32_v20  ;;  %360 = vmatmul.mubr.f32.vlgmr.msra.gmra.mrb[0].mxu1 %v40_v21 }
  0x23   :  { %350 = vmatprep.mubr.f32.mxu0 %v33_v24  ;;  %362 = vmatprep.mubr.f32.mxu1 %v41_v25 }
  0x26   :  { %351 = vmatmul.mubr.f32.gmra.mrb[2].mxu0 %v34_v28  ;;  %363 = vmatmul.mubr.f32.gmra.mrb[2].mxu1 %v42_v29 }
  0x27   :  { %353 = vmatprep.mubr.f32.mxu0 %v35_v32  ;;  %365 = vmatprep.mubr.f32.mxu1 %v43_v33 }
  0x2a   :  { %354 = vmatmul.mubr.f32.gmra.mrb[4].mxu0 %v36_v36  ;;  %366 = vmatmul.mubr.f32.gmra.mrb[4].mxu1 %v44_v37 }
  0x2b   :  { %356 = vmatprep.mubr.f32.mxu0 %v37_v40  ;;  %368 = vmatprep.mubr.f32.mxu1 %v45_v41 }
  0x2e   :  { %357 = vmatmul.mubr.f32.gmra.mrb[6].mxu0 %v38_v42  ;;  %369 = vmatmul.mubr.f32.gmra.mrb[6].mxu1 %v46_v43 }
  0xf5   :  { %v349_v44 = vpop.f32.mrb[0].mxu0  ;;  %v361_v45 = vpop.f32.mrb[0].mxu1 }
  0xf6   :  { %225 = vst [vmem:[%s520_s2 + $0x8] sm:$0xff] %v349_v44  ;;  %233 = vst [vmem:[%s520_s2 + $0x48] sm:$0xff] %v361_v45  ;;  %v145_v46 = vpop.f32.mrb[1].mxu0  ;;  %v185_v47 = vpop.f32.mrb[1].mxu1 }
  0xf7   :  { %224 = vst [vmem:[%s520_s2] sm:$0xff] %v145_v46  ;;  %232 = vst [vmem:[%s520_s2 + $0x40] sm:$0xff] %v185_v47 }
  0xf9   :  { %v352_v48 = vpop.f32.mrb[2].mxu0  ;;  %v364_v49 = vpop.f32.mrb[2].mxu1 }
  0xfa   :  { %227 = vst [vmem:[%s520_s2 + $0x18] sm:$0xff] %v352_v48  ;;  %235 = vst [vmem:[%s520_s2 + $0x58] sm:$0xff] %v364_v49  ;;  %v155_v50 = vpop.f32.mrb[3].mxu0  ;;  %v195_v51 = vpop.f32.mrb[3].mxu1 }
  0xfb   :  { %226 = vst [vmem:[%s520_s2 + $0x10] sm:$0xff] %v155_v50  ;;  %234 = vst [vmem:[%s520_s2 + $0x50] sm:$0xff] %v195_v51 }
  0xfd   :  { %v355_v52 = vpop.f32.mrb[4].mxu0  ;;  %v367_v53 = vpop.f32.mrb[4].mxu1 }
  0xfe   :  { %229 = vst [vmem:[%s520_s2 + $0x28] sm:$0xff] %v355_v52  ;;  %237 = vst [vmem:[%s520_s2 + $0x68] sm:$0xff] %v367_v53  ;;  %v165_v54 = vpop.f32.mrb[5].mxu0  ;;  %v205_v55 = vpop.f32.mrb[5].mxu1 }
  0xff   :  { %228 = vst [vmem:[%s520_s2 + $0x20] sm:$0xff] %v165_v54  ;;  %236 = vst [vmem:[%s520_s2 + $0x60] sm:$0xff] %v205_v55 }
 0x101   :  { %v358_v56 = vpop.f32.mrb[6].mxu0  ;;  %v370_v57 = vpop.f32.mrb[6].mxu1 }
 0x102   :  { %231 = vst [vmem:[%s520_s2 + $0x38] sm:$0xff] %v358_v56  ;;  %239 = vst [vmem:[%s520_s2 + $0x78] sm:$0xff] %v370_v57  ;;  %v175_v58 = vpop.f32.mrb[7].mxu0  ;;  %v215_v59 = vpop.f32.mrb[7].mxu1 }
 0x103   :  { %230 = vst [vmem:[%s520_s2 + $0x30] sm:$0xff] %v175_v58  ;;  %238 = vst [vmem:[%s520_s2 + $0x70] sm:$0xff] %v215_v59 }

// kernel: unigcn_forward.5
= control target key start
LH: loop header
LB: loop body
LE: loop exit
PB: predicated region body
PF: predicated region fallthrough
CT: control target
= control target key end

     0   :  { %s637_s1 = inlined_call_operand.vmem [shape: bf16[128,128], index: 1, kind: input, shape index: {}]   ;;  %s638_s0 = inlined_call_operand.vmem [shape: s8[128,128], index: 0, kind: input, shape index: {}]   ;;  %s639_s2 = inlined_call_operand.vmem [shape: bf16[128,128], index: 2, kind: output, shape index: {}]  }
   0x1   :  { %v341_v0 = vld [vmem:[%s637_s1] sm:$0xff]   ;;  %v412_v1 = vld [vmem:[%s637_s1 + $0x8] sm:$0xff]   ;;  %v13_v4 = vld [vmem:[%s638_s0 + $0x10] sm:$0xff] }
   0x2   :  { %515 = vmatprep.subr.bf16.mxu0 %v341_v0  ;;  %546 = vmatprep.subr.bf16.mxu1 %v341_v0  ;;  %v11_v2 = vld [vmem:[%s638_s0] sm:$0xff]  ;;  %v413_v5 = vld [vmem:[%s637_s1 + $0x10] sm:$0xff]   ;;  %v23_v6 = vunpack.c.0.s8 %v13_v4  ;;  %v414_v9 = vld [vmem:[%s637_s1 + $0x18] sm:$0xff]   ;;  %v24_v15 = vunpack.c.1.s8 %v13_v4  ;;  %v25_v17 = vunpack.c.2.s8 %v13_v4  ;;  %v26_v23 = vunpack.c.3.s8 %v13_v4 }
   0x3   :  { %517 = vmatpush3.bf16.msra.mxu0 %v341_v0  ;;  %554 = vmatpush3.bf16.msra.mxu1 %v341_v0  ;;  %v15_v3 = vunpack.c.0.s8 %v11_v2  ;;  %v415_v10 = vld [vmem:[%s637_s1 + $0x20] sm:$0xff]   ;;  %v416_v11 = vld [vmem:[%s637_s1 + $0x28] sm:$0xff]   ;;  %v417_v12 = vld [vmem:[%s637_s1 + $0x30] sm:$0xff]   ;;  %v16_v14 = vunpack.c.1.s8 %v11_v2  ;;  %v17_v16 = vunpack.c.2.s8 %v11_v2  ;;  %v18_v22 = vunpack.c.3.s8 %v11_v2 }
   0x4   :  { %519 = vmatprep.subr.bf16.mxu0 %v412_v1  ;;  %547 = vmatprep.subr.bf16.mxu1 %v412_v1  ;;  %v39_v8 = vcvt.s32.f32 %v23_v6  ;;  %v418_v13 = vld [vmem:[%s637_s1 + $0x38] sm:$0xff]   ;;  %v12_v18 = vld [vmem:[%s638_s0 + $0x8] sm:$0xff]  ;;  %v40_v21 = vcvt.s32.f32 %v24_v15  ;;  %v41_v25 = vcvt.s32.f32 %v25_v17  ;;  %v42_v29 = vcvt.s32.f32 %v26_v23 }
   0x5   :  { %v31_v7 = vcvt.s32.f32 %v15_v3  ;;  %v14_v19 = vld [vmem:[%s638_s0 + $0x18] sm:$0xff]  ;;  %v32_v20 = vcvt.s32.f32 %v16_v14  ;;  %v33_v24 = vcvt.s32.f32 %v17_v16  ;;  %v19_v26 = vunpack.c.0.s8 %v12_v18 }
   0x6   :  { %502 = vmatprep.mubr.f32.mxu1 %v39_v8  ;;  %v27_v27 = vunpack.c.0.s8 %v14_v19  ;;  %v34_v28 = vcvt.s32.f32 %v18_v22  ;;  %v20_v30 = vunpack.c.1.s8 %v12_v18  ;;  %v28_v31 = vunpack.c.1.s8 %v14_v19 }
   0x7   :  { %521 = vmatpush3.bf16.msra.mxu0 %v412_v1  ;;  %555 = vmatpush3.bf16.msra.mxu1 %v412_v1  ;;  %v35_v32 = vcvt.s32.f32 %v19_v26  ;;  %v21_v34 = vunpack.c.2.s8 %v12_v18  ;;  %v29_v35 = vunpack.c.2.s8 %v14_v19  ;;  %v22_v38 = vunpack.c.3.s8 %v12_v18 }
   0x8   :  { %523 = vmatprep.subr.bf16.mxu0 %v413_v5  ;;  %548 = vmatprep.subr.bf16.mxu1 %v413_v5  ;;  %v43_v33 = vcvt.s32.f32 %v27_v27  ;;  %v36_v36 = vcvt.s32.f32 %v20_v30  ;;  %v44_v37 = vcvt.s32.f32 %v28_v31  ;;  %v30_v39 = vunpack.c.3.s8 %v14_v19 }
   0x9   :  { %490 = vmatprep.mubr.f32.mxu0 %v31_v7  ;;  %v37_v40 = vcvt.s32.f32 %v21_v34  ;;  %v45_v41 = vcvt.s32.f32 %v29_v35  ;;  %v38_v42 = vcvt.s32.f32 %v22_v38 }
   0xa   :  { %v46_v43 = vcvt.s32.f32 %v30_v39 }
   0xb   :  { %525 = vmatpush3.bf16.msra.mxu0 %v413_v5  ;;  %556 = vmatpush3.bf16.msra.mxu1 %v413_v5 }
   0xc   :  { %527 = vmatprep.subr.bf16.mxu0 %v414_v9  ;;  %549 = vmatprep.subr.bf16.mxu1 %v414_v9 }
   0xf   :  { %529 = vmatpush3.bf16.msra.mxu0 %v414_v9  ;;  %557 = vmatpush3.bf16.msra.mxu1 %v414_v9 }
  0x10   :  { %531 = vmatprep.subr.bf16.mxu0 %v415_v10  ;;  %550 = vmatprep.subr.bf16.mxu1 %v415_v10 }
  0x13   :  { %533 = vmatpush3.bf16.msra.mxu0 %v415_v10  ;;  %558 = vmatpush3.bf16.msra.mxu1 %v415_v10 }
  0x14   :  { %535 = vmatprep.subr.bf16.mxu0 %v416_v11  ;;  %551 = vmatprep.subr.bf16.mxu1 %v416_v11 }
  0x17   :  { %537 = vmatpush3.bf16.msra.mxu0 %v416_v11  ;;  %559 = vmatpush3.bf16.msra.mxu1 %v416_v11 }
  0x18   :  { %539 = vmatprep.subr.bf16.mxu0 %v417_v12  ;;  %552 = vmatprep.subr.bf16.mxu1 %v417_v12 }
  0x1b   :  { %541 = vmatpush3.bf16.msra.mxu0 %v417_v12  ;;  %560 = vmatpush3.bf16.msra.mxu1 %v417_v12 }
  0x1c   :  { %543 = vmatprep.subr.bf16.mxu0 %v418_v13  ;;  %553 = vmatprep.subr.bf16.mxu1 %v418_v13 }
  0x1f   :  { %545 = vmatpush3.bf16.msra.mxu0 %v418_v13  ;;  %561 = vmatpush3.bf16.msra.mxu1 %v418_v13 }
  0x22   :  { %491 = vmatmul.mubr.f32.vlgmr.msra.gmra.mrb[0].mxu0 %v32_v20  ;;  %503 = vmatmul.mubr.f32.vlgmr.msra.gmra.mrb[0].mxu1 %v40_v21 }
  0x23   :  { %493 = vmatprep.mubr.f32.mxu0 %v33_v24  ;;  %505 = vmatprep.mubr.f32.mxu1 %v41_v25 }
  0x26   :  { %494 = vmatmul.mubr.f32.gmra.mrb[2].mxu0 %v34_v28  ;;  %506 = vmatmul.mubr.f32.gmra.mrb[2].mxu1 %v42_v29 }
  0x27   :  { %496 = vmatprep.mubr.f32.mxu0 %v35_v32  ;;  %508 = vmatprep.mubr.f32.mxu1 %v43_v33 }
  0x2a   :  { %497 = vmatmul.mubr.f32.gmra.mrb[4].mxu0 %v36_v36  ;;  %509 = vmatmul.mubr.f32.gmra.mrb[4].mxu1 %v44_v37 }
  0x2b   :  { %499 = vmatprep.mubr.f32.mxu0 %v37_v40  ;;  %511 = vmatprep.mubr.f32.mxu1 %v45_v41 }
  0x2e   :  { %500 = vmatmul.mubr.f32.gmra.mrb[6].mxu0 %v38_v42  ;;  %512 = vmatmul.mubr.f32.gmra.mrb[6].mxu1 %v46_v43 }
  0xf5   :  { %v492_v44 = vpop.f32.mrb[0].mxu0  ;;  %v504_v45 = vpop.f32.mrb[0].mxu1 }
  0xf6   :  { %v145_v46 = vpop.f32.mrb[1].mxu0  ;;  %v185_v47 = vpop.f32.mrb[1].mxu1 }
  0xf7   :  { %v375_v48 = vpack.c.bf16 %v492_v44, %v145_v46  ;;  %v395_v49 = vpack.c.bf16 %v504_v45, %v185_v47 }
  0xf9   :  { %376 = vst [vmem:[%s639_s2] sm:$0xff] %v375_v48   ;;  %422 = vst [vmem:[%s639_s2 + $0x20] sm:$0xff] %v395_v49   ;;  %v495_v50 = vpop.f32.mrb[2].mxu0  ;;  %v507_v51 = vpop.f32.mrb[2].mxu1 }
  0xfa   :  { %v155_v52 = vpop.f32.mrb[3].mxu0  ;;  %v195_v53 = vpop.f32.mrb[3].mxu1 }
  0xfb   :  { %v380_v54 = vpack.c.bf16 %v495_v50, %v155_v52  ;;  %v400_v55 = vpack.c.bf16 %v507_v51, %v195_v53 }
  0xfd   :  { %419 = vst [vmem:[%s639_s2 + $0x8] sm:$0xff] %v380_v54   ;;  %423 = vst [vmem:[%s639_s2 + $0x28] sm:$0xff] %v400_v55   ;;  %v498_v56 = vpop.f32.mrb[4].mxu0  ;;  %v510_v57 = vpop.f32.mrb[4].mxu1 }
  0xfe   :  { %v165_v58 = vpop.f32.mrb[5].mxu0  ;;  %v205_v59 = vpop.f32.mrb[5].mxu1 }
  0xff   :  { %v385_v60 = vpack.c.bf16 %v498_v56, %v165_v58  ;;  %v405_v61 = vpack.c.bf16 %v510_v57, %v205_v59 }
 0x101   :  { %420 = vst [vmem:[%s639_s2 + $0x10] sm:$0xff] %v385_v60   ;;  %424 = vst [vmem:[%s639_s2 + $0x30] sm:$0xff] %v405_v61   ;;  %v501_v62 = vpop.f32.mrb[6].mxu0  ;;  %v513_v63 = vpop.f32.mrb[6].mxu1 }
 0x102   :  { %v175_v0 = vpop.f32.mrb[7].mxu0  ;;  %v215_v1 = vpop.f32.mrb[7].mxu1 }
 0x103   :  { %v390_v2 = vpack.c.bf16 %v501_v62, %v175_v0  ;;  %v410_v3 = vpack.c.bf16 %v513_v63, %v215_v1 }
 0x105   :  { %421 = vst [vmem:[%s639_s2 + $0x18] sm:$0xff] %v390_v2   ;;  %425 = vst [vmem:[%s639_s2 + $0x38] sm:$0xff] %v410_v3  }

// kernel: unigcn_forward.4
= control target key start
LH: loop header
LB: loop body
LE: loop exit
PB: predicated region body
PF: predicated region fallthrough
CT: control target
= control target key end

     0   :  { %s1080_s1 = inlined_call_operand.vmem [shape: bf16[128,128], index: 1, kind: input, shape index: {}]   ;;  %s1081_s0 = inlined_call_operand.vmem [shape: s8[128,128], index: 0, kind: input, shape index: {}]   ;;  %s1082_s2 = inlined_call_operand.vmem [shape: bf16[128,128], index: 2, kind: input, shape index: {}]   ;;  %s1083_s3 = inlined_call_operand.vmem [shape: bf16[128,128], index: 3, kind: output, shape index: {}]  }
   0x1   :  { %v612_v0 = vld [vmem:[%s1080_s1] sm:$0xff]   ;;  %v715_v1 = vld [vmem:[%s1080_s1 + $0x8] sm:$0xff]   ;;  %v716_v4 = vld [vmem:[%s1080_s1 + $0x10] sm:$0xff]  }
   0x2   :  { %913 = vmatprep.subr.bf16.mxu0 %v612_v0  ;;  %v14_v2 = vld [vmem:[%s1081_s0] sm:$0xff]  ;;  %v722_v7 = vld [vmem:[%s1082_s2 + $0x8] sm:$0xff]   ;;  %v717_v8 = vld [vmem:[%s1080_s1 + $0x18] sm:$0xff]  }
   0x3   :  { %915 = vmatpush3.bf16.msra.mxu0 %v612_v0  ;;  %v18_v3 = vunpack.c.0.s8 %v14_v2  ;;  %v644_v5 = vld [vmem:[%s1082_s2] sm:$0xff]   ;;  %v723_v9 = vld [vmem:[%s1082_s2 + $0x10] sm:$0xff]   ;;  %v724_v11 = vld [vmem:[%s1082_s2 + $0x18] sm:$0xff]   ;;  %v19_v18 = vunpack.c.1.s8 %v14_v2  ;;  %v20_v19 = vunpack.c.2.s8 %v14_v2  ;;  %v21_v23 = vunpack.c.3.s8 %v14_v2 }
   0x4   :  { %917 = vmatprep.subr.bf16.mxu0 %v715_v1  ;;  %945 = vmatprep.subr.bf16.mxu1 %v644_v5  ;;  %v718_v10 = vld [vmem:[%s1080_s1 + $0x20] sm:$0xff]   ;;  %v719_v12 = vld [vmem:[%s1080_s1 + $0x28] sm:$0xff]   ;;  %v720_v14 = vld [vmem:[%s1080_s1 + $0x30] sm:$0xff]  }
   0x5   :  { %v34_v6 = vcvt.s32.f32 %v18_v3  ;;  %947 = vmatpush3.bf16.msra.mxu1 %v644_v5  ;;  %v725_v13 = vld [vmem:[%s1082_s2 + $0x20] sm:$0xff]   ;;  %v726_v15 = vld [vmem:[%s1082_s2 + $0x28] sm:$0xff]   ;;  %v721_v16 = vld [vmem:[%s1080_s1 + $0x38] sm:$0xff]   ;;  %v35_v22 = vcvt.s32.f32 %v19_v18  ;;  %v36_v24 = vcvt.s32.f32 %v20_v19  ;;  %v37_v26 = vcvt.s32.f32 %v21_v23 }
   0x6   :  { %949 = vmatprep.subr.bf16.mxu1 %v722_v7  ;;  %v727_v17 = vld [vmem:[%s1082_s2 + $0x30] sm:$0xff]   ;;  %v15_v20 = vld [vmem:[%s1081_s0 + $0x8] sm:$0xff]  ;;  %v728_v21 = vld [vmem:[%s1082_s2 + $0x38] sm:$0xff]  }
   0x7   :  { %919 = vmatpush3.bf16.msra.mxu0 %v715_v1  ;;  %832 = vmatprep.mubr.f32.mxu0 %v34_v6  ;;  %v22_v25 = vunpack.c.0.s8 %v15_v20  ;;  %v23_v27 = vunpack.c.1.s8 %v15_v20  ;;  %v24_v29 = vunpack.c.2.s8 %v15_v20  ;;  %v16_v30 = vld [vmem:[%s1081_s0 + $0x10] sm:$0xff]  ;;  %v25_v32 = vunpack.c.3.s8 %v15_v20  ;;  %v17_v39 = vld [vmem:[%s1081_s0 + $0x18] sm:$0xff] }
   0x8   :  { %921 = vmatprep.subr.bf16.mxu0 %v716_v4  ;;  %v26_v34 = vunpack.c.0.s8 %v16_v30  ;;  %v27_v36 = vunpack.c.1.s8 %v16_v30  ;;  %v28_v38 = vunpack.c.2.s8 %v16_v30  ;;  %v29_v41 = vunpack.c.3.s8 %v16_v30 }
   0x9   :  { %951 = vmatpush3.bf16.msra.mxu1 %v722_v7  ;;  %v38_v28 = vcvt.s32.f32 %v22_v25  ;;  %v39_v31 = vcvt.s32.f32 %v23_v27  ;;  %v40_v33 = vcvt.s32.f32 %v24_v29  ;;  %v41_v35 = vcvt.s32.f32 %v25_v32 }
   0xa   :  { %953 = vmatprep.subr.bf16.mxu1 %v723_v9  ;;  %v42_v37 = vcvt.s32.f32 %v26_v34  ;;  %v43_v40 = vcvt.s32.f32 %v27_v36  ;;  %v44_v42 = vcvt.s32.f32 %v28_v38  ;;  %v30_v43 = vunpack.c.0.s8 %v17_v39 }
   0xb   :  { %923 = vmatpush3.bf16.msra.mxu0 %v716_v4  ;;  %v45_v44 = vcvt.s32.f32 %v29_v41  ;;  %v31_v45 = vunpack.c.1.s8 %v17_v39  ;;  %v32_v47 = vunpack.c.2.s8 %v17_v39  ;;  %v33_v49 = vunpack.c.3.s8 %v17_v39 }
   0xc   :  { %925 = vmatprep.subr.bf16.mxu0 %v717_v8  ;;  %v46_v46 = vcvt.s32.f32 %v30_v43 }
   0xd   :  { %955 = vmatpush3.bf16.msra.mxu1 %v723_v9  ;;  %v47_v48 = vcvt.s32.f32 %v31_v45  ;;  %v48_v50 = vcvt.s32.f32 %v32_v47  ;;  %v49_v51 = vcvt.s32.f32 %v33_v49 }
   0xe   :  { %957 = vmatprep.subr.bf16.mxu1 %v724_v11 }
   0xf   :  { %927 = vmatpush3.bf16.msra.mxu0 %v717_v8 }
  0x10   :  { %929 = vmatprep.subr.bf16.mxu0 %v718_v10 }
  0x11   :  { %959 = vmatpush3.bf16.msra.mxu1 %v724_v11 }
  0x12   :  { %961 = vmatprep.subr.bf16.mxu1 %v725_v13 }
  0x13   :  { %931 = vmatpush3.bf16.msra.mxu0 %v718_v10 }
  0x14   :  { %933 = vmatprep.subr.bf16.mxu0 %v719_v12 }
  0x15   :  { %963 = vmatpush3.bf16.msra.mxu1 %v725_v13 }
  0x16   :  { %965 = vmatprep.subr.bf16.mxu1 %v726_v15 }
  0x17   :  { %935 = vmatpush3.bf16.msra.mxu0 %v719_v12 }
  0x18   :  { %937 = vmatprep.subr.bf16.mxu0 %v720_v14 }
  0x19   :  { %967 = vmatpush3.bf16.msra.mxu1 %v726_v15 }
  0x1a   :  { %969 = vmatprep.subr.bf16.mxu1 %v727_v17 }
  0x1b   :  { %939 = vmatpush3.bf16.msra.mxu0 %v720_v14 }
  0x1c   :  { %941 = vmatprep.subr.bf16.mxu0 %v721_v16 }
  0x1d   :  { %971 = vmatpush3.bf16.msra.mxu1 %v727_v17 }
  0x1e   :  { %973 = vmatprep.subr.bf16.mxu1 %v728_v21 }
  0x1f   :  { %943 = vmatpush3.bf16.msra.mxu0 %v721_v16 }
  0x21   :  { %975 = vmatpush3.bf16.msra.mxu1 %v728_v21 }
  0x22   :  { %833 = vmatmul.mubr.f32.vlgmr.msra.gmra.mrb[0].mxu0 %v35_v22 }
  0x23   :  { %835 = vmatprep.mubr.f32.mxu0 %v36_v24 }
  0x26   :  { %836 = vmatmul.mubr.f32.gmra.mrb[2].mxu0 %v37_v26 }
  0x27   :  { %838 = vmatprep.mubr.f32.mxu0 %v38_v28 }
  0x2a   :  { %839 = vmatmul.mubr.f32.gmra.mrb[4].mxu0 %v39_v31 }
  0x2b   :  { %841 = vmatprep.mubr.f32.mxu0 %v40_v33 }
  0x2e   :  { %842 = vmatmul.mubr.f32.gmra.mrb[6].mxu0 %v41_v35 }
  0x2f   :  { %844 = vmatprep.mubr.f32.mxu0 %v42_v37 }
  0x32   :  { %845 = vmatmul.mubr.f32.gmra.mrb[8].mxu0 %v43_v40 }
  0x33   :  { %847 = vmatprep.mubr.f32.mxu0 %v44_v42 }
  0x36   :  { %848 = vmatmul.mubr.f32.gmra.mrb[10].mxu0 %v45_v44 }
  0x37   :  { %850 = vmatprep.mubr.f32.mxu0 %v46_v46 }
  0x3a   :  { %851 = vmatmul.mubr.f32.gmra.mrb[12].mxu0 %v47_v48 }
  0x3b   :  { %853 = vmatprep.mubr.f32.mxu0 %v48_v50 }
  0x3e   :  { %854 = vmatmul.mubr.f32.gmra.mrb[14].mxu0 %v49_v51 }
  0xf5   :  { %v834_v52 = vpop.f32.mrb[0].mxu0 }
  0xf6   :  { %v148_v53 = vpop.f32.mrb[1].mxu0 }
  0xf7   :  { %888 = vmatprep.mubr.f32.mxu1 %v148_v53 }
  0xf8   :  { %889 = vmatmul.mubr.f32.vlgmr.msra.gmra.mrb[0].mxu1 %v834_v52 }
  0xf9   :  { %v837_v54 = vpop.f32.mrb[2].mxu0 }
  0xfa   :  { %v158_v55 = vpop.f32.mrb[3].mxu0 }
  0xfb   :  { %891 = vmatprep.mubr.f32.mxu1 %v158_v55 }
  0xfc   :  { %892 = vmatmul.mubr.f32.gmra.mrb[2].mxu1 %v837_v54 }
  0xfd   :  { %v840_v56 = vpop.f32.mrb[4].mxu0 }
  0xfe   :  { %v168_v57 = vpop.f32.mrb[5].mxu0 }
  0xff   :  { %894 = vmatprep.mubr.f32.mxu1 %v168_v57 }
 0x100   :  { %895 = vmatmul.mubr.f32.gmra.mrb[4].mxu1 %v840_v56 }
 0x101   :  { %v843_v58 = vpop.f32.mrb[6].mxu0 }
 0x102   :  { %v178_v59 = vpop.f32.mrb[7].mxu0 }
 0x103   :  { %897 = vmatprep.mubr.f32.mxu1 %v178_v59 }
 0x104   :  { %898 = vmatmul.mubr.f32.gmra.mrb[6].mxu1 %v843_v58 }
 0x105   :  { %v846_v60 = vpop.f32.mrb[8].mxu0 }
 0x106   :  { %v188_v61 = vpop.f32.mrb[9].mxu0 }
 0x107   :  { %900 = vmatprep.mubr.f32.mxu1 %v188_v61 }
 0x108   :  { %901 = vmatmul.mubr.f32.gmra.mrb[8].mxu1 %v846_v60 }
 0x109   :  { %v849_v62 = vpop.f32.mrb[10].mxu0 }
 0x10a   :  { %v198_v63 = vpop.f32.mrb[11].mxu0 }
 0x10b   :  { %903 = vmatprep.mubr.f32.mxu1 %v198_v63 }
 0x10c   :  { %904 = vmatmul.mubr.f32.gmra.mrb[10].mxu1 %v849_v62 }
 0x10d   :  { %v852_v0 = vpop.f32.mrb[12].mxu0 }
 0x10e   :  { %v208_v1 = vpop.f32.mrb[13].mxu0 }
 0x10f   :  { %906 = vmatprep.mubr.f32.mxu1 %v208_v1 }
 0x110   :  { %907 = vmatmul.mubr.f32.gmra.mrb[12].mxu1 %v852_v0 }
 0x111   :  { %v855_v2 = vpop.f32.mrb[14].mxu0 }
 0x112   :  { %v218_v3 = vpop.f32.mrb[15].mxu0 }
 0x113   :  { %909 = vmatprep.mubr.f32.mxu1 %v218_v3 }
 0x114   :  { %910 = vmatmul.mubr.f32.gmra.mrb[14].mxu1 %v855_v2 }
 0x1cb   :  { %v890_v4 = vpop.f32.mrb[0].mxu1 }
 0x1cc   :  { %v416_v5 = vpop.f32.mrb[1].mxu1 }
 0x1cd   :  { %v678_v6 = vpack.c.bf16 %v890_v4, %v416_v5 }
 0x1cf   :  { %679 = vst [vmem:[%s1083_s3] sm:$0xff] %v678_v6   ;;  %v893_v7 = vpop.f32.mrb[2].mxu1 }
 0x1d0   :  { %v426_v8 = vpop.f32.mrb[3].mxu1 }
 0x1d1   :  { %v683_v9 = vpack.c.bf16 %v893_v7, %v426_v8 }
 0x1d3   :  { %729 = vst [vmem:[%s1083_s3 + $0x8] sm:$0xff] %v683_v9   ;;  %v896_v10 = vpop.f32.mrb[4].mxu1 }
 0x1d4   :  { %v436_v11 = vpop.f32.mrb[5].mxu1 }
 0x1d5   :  { %v688_v12 = vpack.c.bf16 %v896_v10, %v436_v11 }
 0x1d7   :  { %730 = vst [vmem:[%s1083_s3 + $0x10] sm:$0xff] %v688_v12   ;;  %v899_v13 = vpop.f32.mrb[6].mxu1 }
 0x1d8   :  { %v446_v14 = vpop.f32.mrb[7].mxu1 }
 0x1d9   :  { %v693_v15 = vpack.c.bf16 %v899_v13, %v446_v14 }
 0x1db   :  { %731 = vst [vmem:[%s1083_s3 + $0x18] sm:$0xff] %v693_v15   ;;  %v902_v16 = vpop.f32.mrb[8].mxu1 }
 0x1dc   :  { %v456_v17 = vpop.f32.mrb[9].mxu1 }
 0x1dd   :  { %v698_v18 = vpack.c.bf16 %v902_v16, %v456_v17 }
 0x1df   :  { %732 = vst [vmem:[%s1083_s3 + $0x20] sm:$0xff] %v698_v18   ;;  %v905_v19 = vpop.f32.mrb[10].mxu1 }
 0x1e0   :  { %v466_v20 = vpop.f32.mrb[11].mxu1 }
 0x1e1   :  { %v703_v21 = vpack.c.bf16 %v905_v19, %v466_v20 }
 0x1e3   :  { %733 = vst [vmem:[%s1083_s3 + $0x28] sm:$0xff] %v703_v21   ;;  %v908_v22 = vpop.f32.mrb[12].mxu1 }
 0x1e4   :  { %v476_v23 = vpop.f32.mrb[13].mxu1 }
 0x1e5   :  { %v708_v24 = vpack.c.bf16 %v908_v22, %v476_v23 }
 0x1e7   :  { %734 = vst [vmem:[%s1083_s3 + $0x30] sm:$0xff] %v708_v24   ;;  %v911_v25 = vpop.f32.mrb[14].mxu1 }
 0x1e8   :  { %v486_v26 = vpop.f32.mrb[15].mxu1 }
 0x1e9   :  { %v713_v27 = vpack.c.bf16 %v911_v25, %v486_v26 }
 0x1eb   :  { %735 = vst [vmem:[%s1083_s3 + $0x38] sm:$0xff] %v713_v27  }

// kernel: unigcn_forward.6
= control target key start
LH: loop header
LB: loop body
LE: loop exit
PB: predicated region body
PF: predicated region fallthrough
CT: control target
= control target key end

     0   :  { %s1171_s1 = inlined_call_operand.vmem [shape: bf16[128,128], index: 1, kind: input, shape index: {}]   ;;  %s1172_s0 = inlined_call_operand.vmem [shape: s8[128,128], index: 0, kind: input, shape index: {}]   ;;  %s1173_s2 = inlined_call_operand.vmem [shape: bf16[128,128], index: 2, kind: input, shape index: {}]   ;;  %s1174_s4 = inlined_call_operand.vmem [shape: f32[128,128], index: 4, kind: output, shape index: {1}]   ;;  %s1175_s3 = inlined_call_operand.vmem [shape: bf16[128,128], index: 3, kind: output, shape index: {0}]  }
   0x1   :  { %v650_v0 = vld [vmem:[%s1171_s1] sm:$0xff]   ;;  %v753_v1 = vld [vmem:[%s1171_s1 + $0x8] sm:$0xff]   ;;  %v754_v4 = vld [vmem:[%s1171_s1 + $0x10] sm:$0xff]  }
   0x2   :  { %951 = vmatprep.subr.bf16.mxu0 %v650_v0  ;;  %v16_v2 = vld [vmem:[%s1172_s0] sm:$0xff]  ;;  %v760_v7 = vld [vmem:[%s1173_s2 + $0x8] sm:$0xff]   ;;  %v755_v8 = vld [vmem:[%s1171_s1 + $0x18] sm:$0xff]  }
   0x3   :  { %953 = vmatpush3.bf16.msra.mxu0 %v650_v0  ;;  %v20_v3 = vunpack.c.0.s8 %v16_v2  ;;  %v682_v5 = vld [vmem:[%s1173_s2] sm:$0xff]   ;;  %v761_v9 = vld [vmem:[%s1173_s2 + $0x10] sm:$0xff]   ;;  %v762_v11 = vld [vmem:[%s1173_s2 + $0x18] sm:$0xff]   ;;  %v21_v18 = vunpack.c.1.s8 %v16_v2  ;;  %v22_v19 = vunpack.c.2.s8 %v16_v2  ;;  %v23_v23 = vunpack.c.3.s8 %v16_v2 }
   0x4   :  { %955 = vmatprep.subr.bf16.mxu0 %v753_v1  ;;  %983 = vmatprep.subr.bf16.mxu1 %v682_v5  ;;  %v756_v10 = vld [vmem:[%s1171_s1 + $0x20] sm:$0xff]   ;;  %v757_v12 = vld [vmem:[%s1171_s1 + $0x28] sm:$0xff]   ;;  %v758_v14 = vld [vmem:[%s1171_s1 + $0x30] sm:$0xff]  }
   0x5   :  { %v36_v6 = vcvt.s32.f32 %v20_v3  ;;  %985 = vmatpush3.bf16.msra.mxu1 %v682_v5  ;;  %v763_v13 = vld [vmem:[%s1173_s2 + $0x20] sm:$0xff]   ;;  %v764_v15 = vld [vmem:[%s1173_s2 + $0x28] sm:$0xff]   ;;  %v759_v16 = vld [vmem:[%s1171_s1 + $0x38] sm:$0xff]   ;;  %v37_v22 = vcvt.s32.f32 %v21_v18  ;;  %v38_v24 = vcvt.s32.f32 %v22_v19  ;;  %v39_v26 = vcvt.s32.f32 %v23_v23 }
   0x6   :  { %987 = vmatprep.subr.bf16.mxu1 %v760_v7  ;;  %v765_v17 = vld [vmem:[%s1173_s2 + $0x30] sm:$0xff]   ;;  %v17_v20 = vld [vmem:[%s1172_s0 + $0x8] sm:$0xff]  ;;  %v766_v21 = vld [vmem:[%s1173_s2 + $0x38] sm:$0xff]  }
   0x7   :  { %957 = vmatpush3.bf16.msra.mxu0 %v753_v1  ;;  %870 = vmatprep.mubr.f32.mxu0 %v36_v6  ;;  %v24_v25 = vunpack.c.0.s8 %v17_v20  ;;  %v25_v27 = vunpack.c.1.s8 %v17_v20  ;;  %v26_v29 = vunpack.c.2.s8 %v17_v20  ;;  %v18_v30 = vld [vmem:[%s1172_s0 + $0x10] sm:$0xff]  ;;  %v27_v32 = vunpack.c.3.s8 %v17_v20  ;;  %v19_v39 = vld [vmem:[%s1172_s0 + $0x18] sm:$0xff] }
   0x8   :  { %959 = vmatprep.subr.bf16.mxu0 %v754_v4  ;;  %v28_v34 = vunpack.c.0.s8 %v18_v30  ;;  %v29_v36 = vunpack.c.1.s8 %v18_v30  ;;  %v30_v38 = vunpack.c.2.s8 %v18_v30  ;;  %v31_v41 = vunpack.c.3.s8 %v18_v30 }
   0x9   :  { %989 = vmatpush3.bf16.msra.mxu1 %v760_v7  ;;  %v40_v28 = vcvt.s32.f32 %v24_v25  ;;  %v41_v31 = vcvt.s32.f32 %v25_v27  ;;  %v42_v33 = vcvt.s32.f32 %v26_v29  ;;  %v43_v35 = vcvt.s32.f32 %v27_v32 }
   0xa   :  { %991 = vmatprep.subr.bf16.mxu1 %v761_v9  ;;  %v44_v37 = vcvt.s32.f32 %v28_v34  ;;  %v45_v40 = vcvt.s32.f32 %v29_v36  ;;  %v46_v42 = vcvt.s32.f32 %v30_v38  ;;  %v32_v43 = vunpack.c.0.s8 %v19_v39 }
   0xb   :  { %961 = vmatpush3.bf16.msra.mxu0 %v754_v4  ;;  %v47_v44 = vcvt.s32.f32 %v31_v41  ;;  %v33_v45 = vunpack.c.1.s8 %v19_v39  ;;  %v34_v47 = vunpack.c.2.s8 %v19_v39  ;;  %v35_v49 = vunpack.c.3.s8 %v19_v39 }
   0xc   :  { %963 = vmatprep.subr.bf16.mxu0 %v755_v8  ;;  %v48_v46 = vcvt.s32.f32 %v32_v43 }
   0xd   :  { %993 = vmatpush3.bf16.msra.mxu1 %v761_v9  ;;  %v49_v48 = vcvt.s32.f32 %v33_v45  ;;  %v50_v50 = vcvt.s32.f32 %v34_v47  ;;  %v51_v51 = vcvt.s32.f32 %v35_v49 }
   0xe   :  { %995 = vmatprep.subr.bf16.mxu1 %v762_v11 }
   0xf   :  { %965 = vmatpush3.bf16.msra.mxu0 %v755_v8 }
  0x10   :  { %967 = vmatprep.subr.bf16.mxu0 %v756_v10 }
  0x11   :  { %997 = vmatpush3.bf16.msra.mxu1 %v762_v11 }
  0x12   :  { %999 = vmatprep.subr.bf16.mxu1 %v763_v13 }
  0x13   :  { %969 = vmatpush3.bf16.msra.mxu0 %v756_v10 }
  0x14   :  { %971 = vmatprep.subr.bf16.mxu0 %v757_v12 }
  0x15   :  { %1001 = vmatpush3.bf16.msra.mxu1 %v763_v13 }
  0x16   :  { %1003 = vmatprep.subr.bf16.mxu1 %v764_v15 }
  0x17   :  { %973 = vmatpush3.bf16.msra.mxu0 %v757_v12 }
  0x18   :  { %975 = vmatprep.subr.bf16.mxu0 %v758_v14 }
  0x19   :  { %1005 = vmatpush3.bf16.msra.mxu1 %v764_v15 }
  0x1a   :  { %1007 = vmatprep.subr.bf16.mxu1 %v765_v17 }
  0x1b   :  { %977 = vmatpush3.bf16.msra.mxu0 %v758_v14 }
  0x1c   :  { %979 = vmatprep.subr.bf16.mxu0 %v759_v16 }
  0x1d   :  { %1009 = vmatpush3.bf16.msra.mxu1 %v765_v17 }
  0x1e   :  { %1011 = vmatprep.subr.bf16.mxu1 %v766_v21 }
  0x1f   :  { %981 = vmatpush3.bf16.msra.mxu0 %v759_v16 }
  0x21   :  { %1013 = vmatpush3.bf16.msra.mxu1 %v766_v21 }
  0x22   :  { %871 = vmatmul.mubr.f32.vlgmr.msra.gmra.mrb[0].mxu0 %v37_v22 }
  0x23   :  { %873 = vmatprep.mubr.f32.mxu0 %v38_v24 }
  0x26   :  { %874 = vmatmul.mubr.f32.gmra.mrb[2].mxu0 %v39_v26 }
  0x27   :  { %876 = vmatprep.mubr.f32.mxu0 %v40_v28 }
  0x2a   :  { %877 = vmatmul.mubr.f32.gmra.mrb[4].mxu0 %v41_v31 }
  0x2b   :  { %879 = vmatprep.mubr.f32.mxu0 %v42_v33 }
  0x2e   :  { %880 = vmatmul.mubr.f32.gmra.mrb[6].mxu0 %v43_v35 }
  0x2f   :  { %882 = vmatprep.mubr.f32.mxu0 %v44_v37 }
  0x32   :  { %883 = vmatmul.mubr.f32.gmra.mrb[8].mxu0 %v45_v40 }
  0x33   :  { %885 = vmatprep.mubr.f32.mxu0 %v46_v42 }
  0x36   :  { %886 = vmatmul.mubr.f32.gmra.mrb[10].mxu0 %v47_v44 }
  0x37   :  { %888 = vmatprep.mubr.f32.mxu0 %v48_v46 }
  0x3a   :  { %889 = vmatmul.mubr.f32.gmra.mrb[12].mxu0 %v49_v48 }
  0x3b   :  { %891 = vmatprep.mubr.f32.mxu0 %v50_v50 }
  0x3e   :  { %892 = vmatmul.mubr.f32.gmra.mrb[14].mxu0 %v51_v51 }
  0xf5   :  { %v872_v52 = vpop.f32.mrb[0].mxu0 }
  0xf6   :  { %594 = vst [vmem:[%s1174_s4 + $0x8] sm:$0xff] %v872_v52  ;;  %v150_v53 = vpop.f32.mrb[1].mxu0 }
  0xf7   :  { %593 = vst [vmem:[%s1174_s4] sm:$0xff] %v150_v53  ;;  %926 = vmatprep.mubr.f32.mxu1 %v150_v53 }
  0xf8   :  { %927 = vmatmul.mubr.f32.vlgmr.msra.gmra.mrb[0].mxu1 %v872_v52 }
  0xf9   :  { %v875_v54 = vpop.f32.mrb[2].mxu0 }
  0xfa   :  { %596 = vst [vmem:[%s1174_s4 + $0x18] sm:$0xff] %v875_v54  ;;  %v160_v55 = vpop.f32.mrb[3].mxu0 }
  0xfb   :  { %595 = vst [vmem:[%s1174_s4 + $0x10] sm:$0xff] %v160_v55  ;;  %929 = vmatprep.mubr.f32.mxu1 %v160_v55 }
  0xfc   :  { %930 = vmatmul.mubr.f32.gmra.mrb[2].mxu1 %v875_v54 }
  0xfd   :  { %v878_v56 = vpop.f32.mrb[4].mxu0 }
  0xfe   :  { %598 = vst [vmem:[%s1174_s4 + $0x28] sm:$0xff] %v878_v56  ;;  %v170_v57 = vpop.f32.mrb[5].mxu0 }
  0xff   :  { %597 = vst [vmem:[%s1174_s4 + $0x20] sm:$0xff] %v170_v57  ;;  %932 = vmatprep.mubr.f32.mxu1 %v170_v57 }
 0x100   :  { %933 = vmatmul.mubr.f32.gmra.mrb[4].mxu1 %v878_v56 }
 0x101   :  { %v881_v58 = vpop.f32.mrb[6].mxu0 }
 0x102   :  { %600 = vst [vmem:[%s1174_s4 + $0x38] sm:$0xff] %v881_v58  ;;  %v180_v59 = vpop.f32.mrb[7].mxu0 }
 0x103   :  { %599 = vst [vmem:[%s1174_s4 + $0x30] sm:$0xff] %v180_v59  ;;  %935 = vmatprep.mubr.f32.mxu1 %v180_v59 }
 0x104   :  { %936 = vmatmul.mubr.f32.gmra.mrb[6].mxu1 %v881_v58 }
 0x105   :  { %v884_v60 = vpop.f32.mrb[8].mxu0 }
 0x106   :  { %602 = vst [vmem:[%s1174_s4 + $0x48] sm:$0xff] %v884_v60  ;;  %v190_v61 = vpop.f32.mrb[9].mxu0 }
 0x107   :  { %601 = vst [vmem:[%s1174_s4 + $0x40] sm:$0xff] %v190_v61  ;;  %938 = vmatprep.mubr.f32.mxu1 %v190_v61 }
 0x108   :  { %939 = vmatmul.mubr.f32.gmra.mrb[8].mxu1 %v884_v60 }
 0x109   :  { %v887_v62 = vpop.f32.mrb[10].mxu0 }
 0x10a   :  { %604 = vst [vmem:[%s1174_s4 + $0x58] sm:$0xff] %v887_v62  ;;  %v200_v63 = vpop.f32.mrb[11].mxu0 }
 0x10b   :  { %603 = vst [vmem:[%s1174_s4 + $0x50] sm:$0xff] %v200_v63  ;;  %941 = vmatprep.mubr.f32.mxu1 %v200_v63 }
 0x10c   :  { %942 = vmatmul.mubr.f32.gmra.mrb[10].mxu1 %v887_v62 }
 0x10d   :  { %v890_v0 = vpop.f32.mrb[12].mxu0 }
 0x10e   :  { %606 = vst [vmem:[%s1174_s4 + $0x68] sm:$0xff] %v890_v0  ;;  %v210_v1 = vpop.f32.mrb[13].mxu0 }
 0x10f   :  { %605 = vst [vmem:[%s1174_s4 + $0x60] sm:$0xff] %v210_v1  ;;  %944 = vmatprep.mubr.f32.mxu1 %v210_v1 }
 0x110   :  { %945 = vmatmul.mubr.f32.gmra.mrb[12].mxu1 %v890_v0 }
 0x111   :  { %v893_v2 = vpop.f32.mrb[14].mxu0 }
 0x112   :  { %608 = vst [vmem:[%s1174_s4 + $0x78] sm:$0xff] %v893_v2  ;;  %v220_v3 = vpop.f32.mrb[15].mxu0 }
 0x113   :  { %607 = vst [vmem:[%s1174_s4 + $0x70] sm:$0xff] %v220_v3  ;;  %947 = vmatprep.mubr.f32.mxu1 %v220_v3 }
 0x114   :  { %948 = vmatmul.mubr.f32.gmra.mrb[14].mxu1 %v893_v2 }
 0x1cb   :  { %v928_v4 = vpop.f32.mrb[0].mxu1 }
 0x1cc   :  { %v418_v5 = vpop.f32.mrb[1].mxu1 }
 0x1cd   :  { %v716_v6 = vpack.c.bf16 %v928_v4, %v418_v5 }
 0x1cf   :  { %717 = vst [vmem:[%s1175_s3] sm:$0xff] %v716_v6   ;;  %v931_v7 = vpop.f32.mrb[2].mxu1 }
 0x1d0   :  { %v428_v8 = vpop.f32.mrb[3].mxu1 }
 0x1d1   :  { %v721_v9 = vpack.c.bf16 %v931_v7, %v428_v8 }
 0x1d3   :  { %767 = vst [vmem:[%s1175_s3 + $0x8] sm:$0xff] %v721_v9   ;;  %v934_v10 = vpop.f32.mrb[4].mxu1 }
 0x1d4   :  { %v438_v11 = vpop.f32.mrb[5].mxu1 }
 0x1d5   :  { %v726_v12 = vpack.c.bf16 %v934_v10, %v438_v11 }
 0x1d7   :  { %768 = vst [vmem:[%s1175_s3 + $0x10] sm:$0xff] %v726_v12   ;;  %v937_v13 = vpop.f32.mrb[6].mxu1 }
 0x1d8   :  { %v448_v14 = vpop.f32.mrb[7].mxu1 }
 0x1d9   :  { %v731_v15 = vpack.c.bf16 %v937_v13, %v448_v14 }
 0x1db   :  { %769 = vst [vmem:[%s1175_s3 + $0x18] sm:$0xff] %v731_v15   ;;  %v940_v16 = vpop.f32.mrb[8].mxu1 }
 0x1dc   :  { %v458_v17 = vpop.f32.mrb[9].mxu1 }
 0x1dd   :  { %v736_v18 = vpack.c.bf16 %v940_v16, %v458_v17 }
 0x1df   :  { %770 = vst [vmem:[%s1175_s3 + $0x20] sm:$0xff] %v736_v18   ;;  %v943_v19 = vpop.f32.mrb[10].mxu1 }
 0x1e0   :  { %v468_v20 = vpop.f32.mrb[11].mxu1 }
 0x1e1   :  { %v741_v21 = vpack.c.bf16 %v943_v19, %v468_v20 }
 0x1e3   :  { %771 = vst [vmem:[%s1175_s3 + $0x28] sm:$0xff] %v741_v21   ;;  %v946_v22 = vpop.f32.mrb[12].mxu1 }
 0x1e4   :  { %v478_v23 = vpop.f32.mrb[13].mxu1 }
 0x1e5   :  { %v746_v24 = vpack.c.bf16 %v946_v22, %v478_v23 }
 0x1e7   :  { %772 = vst [vmem:[%s1175_s3 + $0x30] sm:$0xff] %v746_v24   ;;  %v949_v25 = vpop.f32.mrb[14].mxu1 }
 0x1e8   :  { %v488_v26 = vpop.f32.mrb[15].mxu1 }
 0x1e9   :  { %v751_v27 = vpack.c.bf16 %v949_v25, %v488_v26 }
 0x1eb   :  { %773 = vst [vmem:[%s1175_s3 + $0x38] sm:$0xff] %v751_v27  }

</bundles_post_ra>
